<compile_context>
chip_gen: v7x
topology: tpu7x:2x2x1
jax: 0.10.0
libtpu: 0.0.40
codegen_flags: <defaults>
</compile_context>

<pallas_src>
import functools

import jax
import jax.numpy as jnp
from jax.experimental import pallas as pl
from jax.experimental.pallas import tpu as pltpu

_LANE = 128      # lane width (last dim)
_SUBLANE = 8     # sublane width for f32 (second-to-last dim)

# Keep the whole weight stack VMEM-resident only while it (plus activation
# tiles) fits comfortably under v7x's 64 MiB per-TensorCore VMEM.
_RESIDENT_BUDGET_BYTES = 44 * 1024 * 1024
_VMEM_SOFT_CAP_BYTES = 56 * 1024 * 1024


def _round_up(x, m):
    return ((x + m - 1) // m) * m


def _apply_activation(y, act):
    if act is None:
        return y
    if act == "relu":
        return jnp.maximum(y, 0.0)
    if act == "tanh":
        return jnp.tanh(y)
    if act == "sigmoid":
        return jax.nn.sigmoid(y)
    raise ValueError(f"unsupported activation: {act}")


# ---------------------------------------------------------------------------
# Kernels
# ---------------------------------------------------------------------------
def _fused_mlp_kernel(*refs, activations):
    """refs = (x_ref, w0, b0, w1, b1, ..., o_ref). Whole MLP in one body."""
    x_ref = refs[0]
    o_ref = refs[-1]
    layer_refs = refs[1:-1]

    h = x_ref[...].astype(jnp.float32)              # (tb, K0p)
    for li, act in enumerate(activations):
        w = layer_refs[2 * li][...]                 # (Kp, Np)  resident VMEM
        b = layer_refs[2 * li + 1][...]             # (1,  Np)  f32
        # MXU matmul: operands in the weight dtype (bf16 on v6e/v7x path),
        # accumulation in f32.
        h = jnp.dot(h.astype(w.dtype), w,
                    preferred_element_type=jnp.float32) + b
        h = _apply_activation(h, act)               # f32 VPU / EUP math
    o_ref[...] = h.astype(o_ref.dtype)


def _single_layer_kernel(x_ref, w_ref, b_ref, o_ref, *, act):
    """Fallback path (stack too big to be VMEM resident): one layer per call."""
    h = jnp.dot(x_ref[...].astype(w_ref.dtype), w_ref[...],
                preferred_element_type=jnp.float32) + b_ref[...]
    o_ref[...] = _apply_activation(h, act).astype(o_ref.dtype)


# ---------------------------------------------------------------------------
# Parameter init (matching nn.Linear defaults) + one-time prepare (pad/cast)
# ---------------------------------------------------------------------------
def init_dnn_params(layers_config, key):
    """weight, bias ~ U(-1/sqrt(in_features), 1/sqrt(in_features)); weight is
    stored pre-transposed (in, out)."""
    params = []
    for (in_size, out_size, _act) in layers_config:
        key, kw, kb = jax.random.split(key, 3)
        bound = 1.0 / (float(in_size) ** 0.5)
        w = jax.random.uniform(kw, (out_size, in_size), jnp.float32,
                               minval=-bound, maxval=bound)
        b = jax.random.uniform(kb, (out_size,), jnp.float32,
                               minval=-bound, maxval=bound)
        params.append((jnp.transpose(w), b.reshape(1, out_size)))
    return params


def prepare_dnn_params(params, layers_config, weight_dtype=jnp.float32):
    """ONE-TIME zero-pad (+ optional bf16 cast) of every weight/bias, hoisted
    out of the forward pass so the per-call kernel never re-pads params."""
    dims = [layers_config[0][0]] + [c[1] for c in layers_config]
    dims_p = [_round_up(d, _LANE) for d in dims]
    padded = []
    for li, ((w_t, b), (kin, kout, _a)) in enumerate(zip(params, layers_config)):
        Kp, Np = dims_p[li], dims_p[li + 1]
        # Zero rows for padded K indices + zero cols for padded N indices.
        w_p = jnp.zeros((Kp, Np), weight_dtype).at[:kin, :kout].set(
            w_t.astype(weight_dtype))
        b_p = jnp.zeros((1, Np), jnp.float32).at[:, :kout].set(
            b.reshape(1, kout).astype(jnp.float32))
        padded += [w_p, b_p]
    return tuple(padded)


# ---------------------------------------------------------------------------
# Tiling / VMEM sizing helpers
# ---------------------------------------------------------------------------
def _act_tile_bytes(tb, dims_p, x_itemsize, out_itemsize):
    return tb * (2 * dims_p[0] * x_itemsize       # double-buffered input tile
                 + 2 * dims_p[-1] * out_itemsize  # double-buffered output tile
                 + 2 * max(dims_p) * 4)           # live f32 intermediate h


def _pick_batch_tile(B, dims_p, x_itemsize, out_itemsize, resident_bytes):
    Bp8 = _round_up(B, _SUBLANE)

    def fits(tb):
        return resident_bytes + _act_tile_bytes(
            tb, dims_p, x_itemsize, out_itemsize) <= _VMEM_SOFT_CAP_BYTES

    # Small batch: one tile, no grid overhead.
    if Bp8 <= 512 and fits(Bp8):
        return Bp8
    # Prefer large tiles that divide the sublane-rounded batch (no padding).
    for tb in (512, 384, 256, 128):
        if Bp8 % tb == 0 and fits(tb):
            return tb
    # Otherwise largest tile that fits VMEM; batch gets padded to a multiple.
    for tb in (512, 256, 128, 64, 32, 16, 8):
        if fits(tb):
            return tb
    return 8


def _vmem_limit_bytes(resident_bytes, tb, dims_p, x_itemsize, out_itemsize):
    need = (resident_bytes
            + _act_tile_bytes(tb, dims_p, x_itemsize, out_itemsize)
            + (4 << 20))                           # headroom
    return int(min(max(need, 16 << 20), 64 << 20))


# ---------------------------------------------------------------------------
# Forward
# ---------------------------------------------------------------------------
def dnn_forward(padded_params, x, *, layers_config):
    """Fused MLP forward. `padded_params` comes from prepare_dnn_params
    (already lane-padded / transposed / cast), so the only per-call data prep
    is (conditional) padding of x."""
    B, K0 = x.shape
    n_layers = len(layers_config)
    assert K0 == layers_config[0][0]

    dims = [layers_config[0][0]] + [c[1] for c in layers_config]
    dims_p = [_round_up(d, _LANE) for d in dims]
    N_last, Np_last = dims[-1], dims_p[-1]
    activations = tuple(a for (_i, _o, a) in layers_config)

    x_itemsize = x.dtype.itemsize
    out_itemsize = x.dtype.itemsize
    resident_bytes = sum(int(p.size) * p.dtype.itemsize for p in padded_params)

    tb = _pick_batch_tile(B, dims_p, x_itemsize, out_itemsize, resident_bytes)
    Bp = _round_up(B, tb)
    grid = (Bp // tb,)

    # Pad x only when needed (avoids an extra HBM pass when already aligned).
    if B == Bp and K0 == dims_p[0]:
        x_p = x
    else:
        x_p = jnp.zeros((Bp, dims_p[0]), x.dtype).at[:B, :K0].set(x)

    # Full-array, single-buffered VMEM residency for every weight and bias.
    vmem_spec = pl.BlockSpec(memory_space=pltpu.MemorySpace.VMEM)
    vmem_limit = _vmem_limit_bytes(resident_bytes, tb, dims_p,
                                   x_itemsize, out_itemsize)

    flops = sum(2 * Bp * dims_p[li] * dims_p[li + 1] for li in range(n_layers))
    transcendentals = sum(Bp * dims_p[li + 1]
                          for li, a in enumerate(activations)
                          if a in ("tanh", "sigmoid"))
    bytes_accessed = int(x_p.size) * x_itemsize + resident_bytes \
        + Bp * Np_last * out_itemsize

    use_fused = (resident_bytes
                 + _act_tile_bytes(tb, dims_p, x_itemsize, out_itemsize)
                 <= _RESIDENT_BUDGET_BYTES)

    if use_fused:
        in_specs = [pl.BlockSpec((tb, dims_p[0]), lambda i: (i, 0))]
        in_specs += [vmem_spec] * (2 * n_layers)
        out_specs = pl.BlockSpec((tb, Np_last), lambda i: (i, 0))

        out_p = pl.pallas_call(
            functools.partial(_fused_mlp_kernel, activations=activations),
            out_shape=jax.ShapeDtypeStruct((Bp, Np_last), x.dtype),
            grid=grid,
            in_specs=in_specs,
            out_specs=out_specs,
            compiler_params=pltpu.CompilerParams(
                dimension_semantics=("parallel",),
                vmem_limit_bytes=vmem_limit),
            cost_estimate=pl.CostEstimate(flops=flops,
                                          transcendentals=transcendentals,
                                          bytes_accessed=bytes_accessed),
        )(x_p, *padded_params)
    else:
        # Stack too large to hold resident (e.g. v7x 64 MiB VMEM): run one
        # pallas_call per layer, each layer's weight resident on its own.
        # TODO(synk): stream weights inside a single fused kernel with
        #             pltpu.emit_pipeline to avoid HBM round-trips of h.
        h = x_p
        for li, act in enumerate(activations):
            Kp, Np = dims_p[li], dims_p[li + 1]
            w_p, b_p = padded_params[2 * li], padded_params[2 * li + 1]
            layer_resident = int(w_p.size) * w_p.dtype.itemsize \
                + int(b_p.size) * b_p.dtype.itemsize
            layer_dims = [Kp, Np]
            layer_limit = _vmem_limit_bytes(layer_resident, tb, layer_dims,
                                            x_itemsize, out_itemsize)
            layer_flops = 2 * Bp * Kp * Np
            layer_trans = Bp * Np if act in ("tanh", "sigmoid") else 0
            layer_bytes = Bp * Kp * x_itemsize + layer_resident \
                + Bp * Np * out_itemsize
            h = pl.pallas_call(
                functools.partial(_single_layer_kernel, act=act),
                out_shape=jax.ShapeDtypeStruct((Bp, Np), x.dtype),
                grid=grid,
                in_specs=[pl.BlockSpec((tb, Kp), lambda i: (i, 0)),
                          vmem_spec, vmem_spec],
                out_specs=pl.BlockSpec((tb, Np), lambda i: (i, 0)),
                compiler_params=pltpu.CompilerParams(
                    dimension_semantics=("parallel",),
                    vmem_limit_bytes=layer_limit),
                cost_estimate=pl.CostEstimate(flops=layer_flops,
                                              transcendentals=layer_trans,
                                              bytes_accessed=layer_bytes),
            )(h, w_p, b_p)
        out_p = h

    if B == Bp and N_last == Np_last:
        return out_p
    return out_p[:B, :N_last]


# ---------------------------------------------------------------------------
# Reference (pure JAX)
# ---------------------------------------------------------------------------
def dnn_forward_ref(params, layers_config, x):
    h = x
    for (w_t, b), (_in, _out, act) in zip(params, layers_config):
        h = h @ w_t + b
        h = _apply_activation(h, act)
    return h


if __name__ == "__main__":
    # layers_config mirrors the PyTorch constructor:
    # [(in_size, out_size, activation), ...]; activation None => no activation.
    layers_config = [
        (32, 64, "relu"),
        (64, 64, "tanh"),
        (64, 16, None),
    ]

    key = jax.random.PRNGKey(0)
    key, kx, kx2 = jax.random.split(key, 3)

    params = init_dnn_params(layers_config, key)
    ref_full = lambda xx: dnn_forward_ref(params, layers_config, xx)

    # ---- f32 weights (exact-path check), tiny batch -----------------------
    prepared_f32 = prepare_dnn_params(params, layers_config, jnp.float32)
    fwd = jax.jit(functools.partial(dnn_forward, layers_config=layers_config))

    batch = 8
    x = jax.random.normal(kx, (batch, layers_config[0][0]), jnp.float32)
    out = jax.block_until_ready(fwd(prepared_f32, x))
    assert out.shape == (batch, layers_config[-1][1])
    assert jnp.allclose(out, ref_full(x), atol=1e-5, rtol=1e-5), \
        "f32 mismatch vs reference"

    # ---- non-aligned batch (exercises pad + slice-off path) ---------------
    batch2 = 200
    x2 = jax.random.normal(kx2, (batch2, layers_config[0][0]), jnp.float32)
    out2 = jax.block_until_ready(fwd(prepared_f32, x2))
    assert out2.shape == (batch2, layers_config[-1][1])
    assert jnp.allclose(out2, ref_full(x2), atol=1e-5, rtol=1e-5), \
        "f32 (padded batch) mismatch vs reference"

    # ---- bf16 weights (MXU-native operands, f32 accumulation) -------------
    prepared_bf16 = prepare_dnn_params(params, layers_config, jnp.bfloat16)
    out_bf16 = jax.block_until_ready(fwd(prepared_bf16, x))
    assert jnp.allclose(out_bf16, ref_full(x), atol=5e-2, rtol=5e-2), \
        "bf16 mismatch vs reference (beyond bf16 tolerance)"

    print("KERNEL_OK")
</pallas_src>

<mosaic_0001>
module attributes {stable_mosaic.version = 11 : i64} {
  func.func @_fused_mlp_kernel(%arg0: i32, %arg1: memref<8x128xf32, #tpu.memory_space<vmem>>, %arg2: memref<128x128xf32, #tpu.memory_space<vmem>>, %arg3: memref<1x128xf32, #tpu.memory_space<vmem>>, %arg4: memref<128x128xf32, #tpu.memory_space<vmem>>, %arg5: memref<1x128xf32, #tpu.memory_space<vmem>>, %arg6: memref<128x128xf32, #tpu.memory_space<vmem>>, %arg7: memref<1x128xf32, #tpu.memory_space<vmem>>, %arg8: memref<8x128xf32, #tpu.memory_space<vmem>>) attributes {dimension_semantics = [#tpu.dimension_semantics<parallel>], iteration_bounds = array<i64: 1>, scalar_prefetch = 0 : i64, scratch_operands = 0 : i64, tpu.core_type = #tpu.core_type<tc>, window_params = [{transform_indices = @transform_0, window_bounds = array<i64: 8, 128>}, {pipeline_mode = #tpu.pipeline_mode<synchronous>, transform_indices = @transform_1, window_bounds = array<i64: 128, 128>}, {pipeline_mode = #tpu.pipeline_mode<synchronous>, transform_indices = @transform_2, window_bounds = array<i64: 1, 128>}, {pipeline_mode = #tpu.pipeline_mode<synchronous>, transform_indices = @transform_3, window_bounds = array<i64: 128, 128>}, {pipeline_mode = #tpu.pipeline_mode<synchronous>, transform_indices = @transform_4, window_bounds = array<i64: 1, 128>}, {pipeline_mode = #tpu.pipeline_mode<synchronous>, transform_indices = @transform_5, window_bounds = array<i64: 128, 128>}, {pipeline_mode = #tpu.pipeline_mode<synchronous>, transform_indices = @transform_6, window_bounds = array<i64: 1, 128>}, {transform_indices = @transform_7, window_bounds = array<i64: 8, 128>}]} {
    %c0 = arith.constant 0 : index
    %c0_0 = arith.constant 0 : index
    %0 = vector.load %arg1[%c0, %c0_0] : memref<8x128xf32, #tpu.memory_space<vmem>>, vector<8x128xf32>
    %c0_1 = arith.constant 0 : index
    %c0_2 = arith.constant 0 : index
    %1 = vector.load %arg2[%c0_1, %c0_2] : memref<128x128xf32, #tpu.memory_space<vmem>>, vector<128x128xf32>
    %c0_3 = arith.constant 0 : index
    %c0_4 = arith.constant 0 : index
    %2 = vector.load %arg3[%c0_3, %c0_4] : memref<1x128xf32, #tpu.memory_space<vmem>>, vector<1x128xf32>
    %cst = arith.constant dense<0.000000e+00> : vector<8x128xf32>
    %3 = tpu.matmul %0, %1, %cst {dimension_numbers = #tpu.dot_dimension_numbers<[1], [0], [0], [1], [0, 0, 1, 1], [], []>} : vector<8x128xf32>, vector<128x128xf32>, vector<8x128xf32> -> vector<8x128xf32>
    %4 = vector.broadcast %2 : vector<1x128xf32> to vector<8x128xf32>
    %5 = arith.addf %3, %4 : vector<8x128xf32>
    %cst_5 = arith.constant 0.000000e+00 : f32
    %6 = vector.broadcast %cst_5 : f32 to vector<8x128xf32>
    %7 = arith.maximumf %5, %6 : vector<8x128xf32>
    %c0_6 = arith.constant 0 : index
    %c0_7 = arith.constant 0 : index
    %8 = vector.load %arg4[%c0_6, %c0_7] : memref<128x128xf32, #tpu.memory_space<vmem>>, vector<128x128xf32>
    %c0_8 = arith.constant 0 : index
    %c0_9 = arith.constant 0 : index
    %9 = vector.load %arg5[%c0_8, %c0_9] : memref<1x128xf32, #tpu.memory_space<vmem>>, vector<1x128xf32>
    %cst_10 = arith.constant dense<0.000000e+00> : vector<8x128xf32>
    %10 = tpu.matmul %7, %8, %cst_10 {dimension_numbers = #tpu.dot_dimension_numbers<[1], [0], [0], [1], [0, 0, 1, 1], [], []>} : vector<8x128xf32>, vector<128x128xf32>, vector<8x128xf32> -> vector<8x128xf32>
    %11 = vector.broadcast %9 : vector<1x128xf32> to vector<8x128xf32>
    %12 = arith.addf %10, %11 : vector<8x128xf32>
    %13 = math.tanh %12 : vector<8x128xf32>
    %c0_11 = arith.constant 0 : index
    %c0_12 = arith.constant 0 : index
    %14 = vector.load %arg6[%c0_11, %c0_12] : memref<128x128xf32, #tpu.memory_space<vmem>>, vector<128x128xf32>
    %c0_13 = arith.constant 0 : index
    %c0_14 = arith.constant 0 : index
    %15 = vector.load %arg7[%c0_13, %c0_14] : memref<1x128xf32, #tpu.memory_space<vmem>>, vector<1x128xf32>
    %cst_15 = arith.constant dense<0.000000e+00> : vector<8x128xf32>
    %16 = tpu.matmul %13, %14, %cst_15 {dimension_numbers = #tpu.dot_dimension_numbers<[1], [0], [0], [1], [0, 0, 1, 1], [], []>} : vector<8x128xf32>, vector<128x128xf32>, vector<8x128xf32> -> vector<8x128xf32>
    %17 = vector.broadcast %15 : vector<1x128xf32> to vector<8x128xf32>
    %18 = arith.addf %16, %17 : vector<8x128xf32>
    %c0_16 = arith.constant 0 : index
    %c0_17 = arith.constant 0 : index
    %19 = vector.load %arg8[%c0_16, %c0_17] : memref<8x128xf32, #tpu.memory_space<vmem>>, vector<8x128xf32>
    tpu.vector_store %arg8[%c0_16, %c0_17], %18 {strides = array<i32>} : memref<8x128xf32, #tpu.memory_space<vmem>>, vector<8x128xf32>,
    return
  }
  func.func @transform_0(%arg0: i32) -> (i32, i32) {
    %c0_i32 = arith.constant 0 : i32
    %c0_i32_0 = arith.constant 0 : i32
    return %arg0, %c0_i32 : i32, i32
  }
  func.func @transform_1(%arg0: i32) -> (i32, i32) {
    %c0_i32 = arith.constant 0 : i32
    %c0_i32_0 = arith.constant 0 : i32
    %c0_i32_1 = arith.constant 0 : i32
    return %c0_i32, %c0_i32_0 : i32, i32
  }
  func.func @transform_2(%arg0: i32) -> (i32, i32) {
    %c0_i32 = arith.constant 0 : i32
    %c0_i32_0 = arith.constant 0 : i32
    %c0_i32_1 = arith.constant 0 : i32
    return %c0_i32, %c0_i32_0 : i32, i32
  }
  func.func @transform_3(%arg0: i32) -> (i32, i32) {
    %c0_i32 = arith.constant 0 : i32
    %c0_i32_0 = arith.constant 0 : i32
    %c0_i32_1 = arith.constant 0 : i32
    return %c0_i32, %c0_i32_0 : i32, i32
  }
  func.func @transform_4(%arg0: i32) -> (i32, i32) {
    %c0_i32 = arith.constant 0 : i32
    %c0_i32_0 = arith.constant 0 : i32
    %c0_i32_1 = arith.constant 0 : i32
    return %c0_i32, %c0_i32_0 : i32, i32
  }
  func.func @transform_5(%arg0: i32) -> (i32, i32) {
    %c0_i32 = arith.constant 0 : i32
    %c0_i32_0 = arith.constant 0 : i32
    %c0_i32_1 = arith.constant 0 : i32
    return %c0_i32, %c0_i32_0 : i32, i32
  }
  func.func @transform_6(%arg0: i32) -> (i32, i32) {
    %c0_i32 = arith.constant 0 : i32
    %c0_i32_0 = arith.constant 0 : i32
    %c0_i32_1 = arith.constant 0 : i32
    return %c0_i32, %c0_i32_0 : i32, i32
  }
  func.func @transform_7(%arg0: i32) -> (i32, i32) {
    %c0_i32 = arith.constant 0 : i32
    %c0_i32_0 = arith.constant 0 : i32
    return %arg0, %c0_i32 : i32, i32
  }
}

</mosaic_0001>

<bundles_post_ra>
// kernel: dnn_forward.1
= control target key start
LH: loop header
LB: loop body
LE: loop exit
PB: predicated region body
PF: predicated region fallthrough
CT: control target
= control target key end

     0   :  { %12 = vsyncpa [#allocation3], 0  ;;  %s858_s0 = inlined_call_operand.vmem [shape: f32[8,128], index: 0, kind: input, shape index: {}]   ;;  %s859_s1 = inlined_call_operand.hbm [shape: f32[128,128], index: 1, kind: input, shape index: {}]   ;;  %s860_s2 = inlined_call_operand.vmem [shape: f32[1,128], index: 2, kind: input, shape index: {}]   ;;  %s861_s3 = inlined_call_operand.hbm [shape: f32[128,128], index: 3, kind: input, shape index: {}]   ;;  %s862_s4 = inlined_call_operand.vmem [shape: f32[1,128], index: 4, kind: input, shape index: {}]   ;;  %s863_s5 = inlined_call_operand.hbm [shape: f32[128,128], index: 5, kind: input, shape index: {}]   ;;  %s864_s6 = inlined_call_operand.vmem [shape: f32[1,128], index: 6, kind: input, shape index: {}]   ;;  %s865_s7 = inlined_call_operand.hbm [shape: f32[8,128], index: 7, kind: output, shape index: {}]  }
   0x1   :  { %13 = vsyncpa [#allocation6], 0 }
   0x2   :  { %14 = vsyncpa [#allocation4], 0  ;;  %s703_s24 = smov [#allocation5]   ;;  %s704_s26 = smov [#allocation2]  }
   0x3   :  { %s36_s25 = sshll.u32 %s703_s24, 4  ;;  %s22_s27 = sshll.u32 %s704_s26, 4  ;;  %s37_s25 = int_to_ptr.vmem [resolvable:$true] %s36_s25  ;;  %s752_s27 = int_to_ptr.vmem [resolvable:$true] %s22_s27 }
   0x4   :  { %s609_s30 = scalar_lea.hbm %s861_s3, 2048 }
   0x5   :  { %p610_p0 = scmp.ne.s32.totalorder %s861_s3, %s609_s30  ;;  %p613_p1 = scmp.lt.u32.totalorder %s609_s30, %s861_s3 }
   0x7   :  { %p615_p2 = pnand %p613_p1, %p610_p0 }
   0x9   :  { %618 = shalt.err (!%p615_p2)
}
   0xa   :  { %s619_s12 = scalar_lea.vmem %s37_s25, 2048  ;;  %p624_p4 = scmp.lt.s32.totalorder %s37_s25, %s37_s25 }
   0xb   :  { %p620_p3 = scmp.ne.s32.totalorder %s37_s25, %s619_s12  ;;  %p625_p5 = scmp.lt.s32.totalorder %s619_s12, %s619_s12 }
   0xd   :  { %p626_p6 = por %p625_p5, %p624_p4 }
   0xf   :  { %p627_p7 = pnand %p626_p6, %p620_p3 }
  0x11   :  { %630 = shalt.err (!%p627_p7)
}
  0x12   :  { %s705_s13 = smov 128   ;;  %s706_s14 = smov 8  }
  0x13   :  { %42 = dma.hbm_to_vmem [thread:$0]  %s861_s3, 2048, %s37_s25, [#allocation6], %s705_s13, %s705_s13, %s706_s14  }
  0x14   :  { %s631_s19 = scalar_lea.hbm %s859_s1, 2048 }
  0x15   :  { %p632_p8 = scmp.ne.s32.totalorder %s859_s1, %s631_s19  ;;  %p635_p9 = scmp.lt.u32.totalorder %s631_s19, %s859_s1 }
  0x17   :  { %p637_p10 = pnand %p635_p9, %p632_p8 }
  0x19   :  { %640 = shalt.err (!%p637_p10)
}
  0x1a   :  { %s641_s24 = scalar_lea.vmem %s752_s27, 2048  ;;  %p646_p12 = scmp.lt.s32.totalorder %s752_s27, %s752_s27 }
  0x1b   :  { %p642_p11 = scmp.ne.s32.totalorder %s752_s27, %s641_s24  ;;  %p647_p13 = scmp.lt.s32.totalorder %s641_s24, %s641_s24 }
  0x1d   :  { %p648_p0 = por %p647_p13, %p646_p12 }
  0x1f   :  { %p649_p1 = pnand %p648_p0, %p642_p11 }
  0x21   :  { %652 = shalt.err (!%p649_p1)
}
  0x22   :  { %28 = dma.hbm_to_vmem [thread:$0]  %s859_s1, 2048, %s752_s27, [#allocation3], %s705_s13, %s705_s13, %s706_s14  }
  0x23   :  { %s707_s26 = smov [#allocation7]   ;;  %s653_s8 = scalar_lea.hbm %s863_s5, 2048 }
  0x24   :  { %s50_s28 = sshll.u32 %s707_s26, 4  ;;  %p654_p2 = scmp.ne.s32.totalorder %s863_s5, %s653_s8  ;;  %s51_s28 = int_to_ptr.vmem [resolvable:$true] %s50_s28 }
  0x25   :  { %p657_p3 = scmp.lt.u32.totalorder %s653_s8, %s863_s5 }
  0x27   :  { %p659_p4 = pnand %p657_p3, %p654_p2 }
  0x29   :  { %662 = shalt.err (!%p659_p4)
}
  0x2a   :  { %s663_s15 = scalar_lea.vmem %s51_s28, 2048  ;;  %p668_p6 = scmp.lt.s32.totalorder %s51_s28, %s51_s28 }
  0x2b   :  { %p664_p5 = scmp.ne.s32.totalorder %s51_s28, %s663_s15  ;;  %p669_p7 = scmp.lt.s32.totalorder %s663_s15, %s663_s15 }
  0x2d   :  { %p670_p8 = por %p669_p7, %p668_p6 }
  0x2f   :  { %p671_p9 = pnand %p670_p8, %p664_p5 }
  0x31   :  { %674 = shalt.err (!%p671_p9)
}
  0x32   :  { %56 = dma.hbm_to_vmem [thread:$0]  %s863_s5, 2048, %s51_s28, [#allocation6], %s705_s13, %s705_s13, %s706_s14  }
  0x33   :  { %697 = dma.done.wait [#allocation3], 2048  }
  0x34   :  { %698 = vsyncadd [#allocation3], 4294965248 }
  0x35   :  { %699 = dma.done.wait [#allocation6], 4096  }
  0x36   :  { %700 = vsyncadd [#allocation6], 4294963200  ;;  %v708_v0 = vmov 0.0|0.0   ;;  %vm709_vm0 = vmmov 0   ;;  %v710_v1 = vmov 0.0   ;;  %v69_v2 = vld [vmem:[#allocation2] sm:$0xff] }
  0x37   :  { %526 = vmatprep.subr.bf16.mxu0 %v708_v0  ;;  %453 = vmatprep.mubr.msk.f32.mxu0 %vm709_vm0, %v710_v1  ;;  %v70_v3 = vld [vmem:[#allocation2 + $0x8] sm:$0xff]  ;;  %v71_v4 = vld [vmem:[#allocation2 + $0x10] sm:$0xff]  ;;  %v72_v6 = vld [vmem:[#allocation2 + $0x18] sm:$0xff]  ;;  %s711_s19 = smov [#allocation8]  }
  0x38   :  { %550 = vmatprep.subr.bf16.mxu1 %v708_v0  ;;  %488 = vmatprep.mubr.msk.f32.mxu1 %vm709_vm0, %v710_v1  ;;  %v527_v5 = vpack.c.bf16 %v70_v3, %v69_v2  ;;  %v530_v7 = vpack.c.bf16 %v72_v6, %v71_v4  ;;  %v73_v8 = vld [vmem:[#allocation2 + $0x20] sm:$0xff]  ;;  %v74_v9 = vld [vmem:[#allocation2 + $0x28] sm:$0xff]  ;;  %v165_v12 = vld [vmem:[#allocation5 + $0x10] sm:$0xff]  ;;  %s357_s20 = sshll.u32 %s711_s19, 4  ;;  %s358_s20 = int_to_ptr.vmem [resolvable:$true] %s357_s20 }
  0x39   :  { %v163_v10 = vld [vmem:[#allocation5] sm:$0xff]  ;;  %v164_v11 = vld [vmem:[#allocation5 + $0x8] sm:$0xff]  ;;  %v166_v13 = vld [vmem:[#allocation5 + $0x18] sm:$0xff]  ;;  %v533_v14 = vpack.c.bf16 %v74_v9, %v73_v8  ;;  %s675_s21 = scalar_lea.vmem %s358_s20, 128  ;;  %p680_p11 = scmp.lt.s32.totalorder %s358_s20, %s358_s20 }
  0x3a   :  { %528 = vmatpush3.bf16.msra.mxu0 %v527_v5  ;;  %v551_v15 = vpack.c.bf16 %v164_v11, %v163_v10  ;;  %v75_v16 = vld [vmem:[#allocation2 + $0x30] sm:$0xff]  ;;  %v76_v17 = vld [vmem:[#allocation2 + $0x38] sm:$0xff]  ;;  %v554_v18 = vpack.c.bf16 %v166_v13, %v165_v12  ;;  %v167_v19 = vld [vmem:[#allocation5 + $0x20] sm:$0xff]  ;;  %p676_p10 = scmp.ne.s32.totalorder %s358_s20, %s675_s21  ;;  %p681_p12 = scmp.lt.s32.totalorder %s675_s21, %s675_s21 }
  0x3b   :  { %529 = vmatprep.subr.bf16.mxu0 %v708_v0  ;;  %v168_v20 = vld [vmem:[#allocation5 + $0x28] sm:$0xff]  ;;  %v536_v21 = vpack.c.bf16 %v76_v17, %v75_v16  ;;  %v77_v22 = vld [vmem:[#allocation2 + $0x40] sm:$0xff]  ;;  %v169_v25 = vld [vmem:[#allocation5 + $0x30] sm:$0xff] }
  0x3c   :  { %552 = vmatpush3.bf16.msra.mxu1 %v551_v15  ;;  %v78_v23 = vld [vmem:[#allocation2 + $0x48] sm:$0xff]  ;;  %v557_v24 = vpack.c.bf16 %v168_v20, %v167_v19  ;;  %v170_v26 = vld [vmem:[#allocation5 + $0x38] sm:$0xff]  ;;  %v79_v28 = vld [vmem:[#allocation2 + $0x50] sm:$0xff]  ;;  %p682_p13 = por %p681_p12, %p680_p11 }
  0x3d   :  { %553 = vmatprep.subr.bf16.mxu1 %v708_v0  ;;  %v539_v27 = vpack.c.bf16 %v78_v23, %v77_v22  ;;  %v80_v29 = vld [vmem:[#allocation2 + $0x58] sm:$0xff]  ;;  %v560_v30 = vpack.c.bf16 %v170_v26, %v169_v25  ;;  %v171_v31 = vld [vmem:[#allocation5 + $0x40] sm:$0xff]  ;;  %v172_v32 = vld [vmem:[#allocation5 + $0x48] sm:$0xff] }
  0x3e   :  { %531 = vmatpush3.bf16.msra.mxu0 %v530_v7  ;;  %v542_v33 = vpack.c.bf16 %v80_v29, %v79_v28  ;;  %v81_v34 = vld [vmem:[#allocation2 + $0x60] sm:$0xff]  ;;  %v82_v35 = vld [vmem:[#allocation2 + $0x68] sm:$0xff]  ;;  %v563_v36 = vpack.c.bf16 %v172_v32, %v171_v31  ;;  %v173_v37 = vld [vmem:[#allocation5 + $0x50] sm:$0xff]  ;;  %p683_p0 = pnand %p682_p13, %p676_p10 }
  0x3f   :  { %532 = vmatprep.subr.bf16.mxu0 %v708_v0  ;;  %v174_v38 = vld [vmem:[#allocation5 + $0x58] sm:$0xff]  ;;  %v545_v39 = vpack.c.bf16 %v82_v35, %v81_v34  ;;  %v83_v40 = vld [vmem:[#allocation2 + $0x70] sm:$0xff]  ;;  %v175_v43 = vld [vmem:[#allocation5 + $0x60] sm:$0xff] }
  0x40   :  { %555 = vmatpush3.bf16.msra.mxu1 %v554_v18  ;;  %v84_v41 = vld [vmem:[#allocation2 + $0x78] sm:$0xff]  ;;  %v566_v42 = vpack.c.bf16 %v174_v38, %v173_v37  ;;  %v176_v44 = vld [vmem:[#allocation5 + $0x68] sm:$0xff]  ;;  %v68_v47 = vld [vmem:[%s858_s0] sm:$0xff] }
  0x41   :  { %556 = vmatprep.subr.bf16.mxu1 %v708_v0  ;;  %v548_v45 = vpack.c.bf16 %v84_v41, %v83_v40  ;;  %v569_v46 = vpack.c.bf16 %v176_v44, %v175_v43  ;;  %v177_v48 = vld [vmem:[#allocation5 + $0x70] sm:$0xff]  ;;  %v178_v49 = vld [vmem:[#allocation5 + $0x78] sm:$0xff]  ;;  %v257_v51 = vld [vmem:[#allocation7] sm:$0xff] }
  0x42   :  { %534 = vmatpush3.bf16.msra.mxu0 %v533_v14  ;;  %v572_v50 = vpack.c.bf16 %v178_v49, %v177_v48  ;;  %v258_v52 = vld [vmem:[#allocation7 + $0x8] sm:$0xff]  ;;  %v259_v53 = vld [vmem:[#allocation7 + $0x10] sm:$0xff]  ;;  %v260_v55 = vld [vmem:[#allocation7 + $0x18] sm:$0xff] }
  0x43   :  { %535 = vmatprep.subr.bf16.mxu0 %v708_v0  ;;  %v575_v54 = vpack.c.bf16 %v258_v52, %v257_v51  ;;  %v578_v56 = vpack.c.bf16 %v260_v55, %v259_v53  ;;  %v261_v57 = vld [vmem:[#allocation7 + $0x20] sm:$0xff]  ;;  %v262_v58 = vld [vmem:[#allocation7 + $0x28] sm:$0xff]  ;;  %v263_v60 = vld [vmem:[#allocation7 + $0x30] sm:$0xff] }
  0x44   :  { %558 = vmatpush3.bf16.msra.mxu1 %v557_v24  ;;  %v581_v59 = vpack.c.bf16 %v262_v58, %v261_v57  ;;  %v264_v61 = vld [vmem:[#allocation7 + $0x38] sm:$0xff]  ;;  %v265_v63 = vld [vmem:[#allocation7 + $0x40] sm:$0xff]  ;;  %v267_v8 = vld [vmem:[#allocation7 + $0x50] sm:$0xff] }
  0x45   :  { %559 = vmatprep.subr.bf16.mxu1 %v708_v0  ;;  %v584_v62 = vpack.c.bf16 %v264_v61, %v263_v60  ;;  %v367_v3 = vld [vmem:[%s860_s2] ss:$0 sm:$0xff]  ;;  %v268_v9 = vld [vmem:[#allocation7 + $0x58] sm:$0xff]  ;;  %v270_v12 = vld [vmem:[#allocation7 + $0x68] sm:$0xff] }
  0x46   :  { %537 = vmatpush3.bf16.msra.mxu0 %v536_v21  ;;  %v590_v10 = vpack.c.bf16 %v268_v9, %v267_v8  ;;  %v269_v11 = vld [vmem:[#allocation7 + $0x60] sm:$0xff]  ;;  %v271_v14 = vld [vmem:[#allocation7 + $0x70] sm:$0xff]  ;;  %v272_v15 = vld [vmem:[#allocation7 + $0x78] sm:$0xff] }
  0x47   :  { %538 = vmatprep.subr.bf16.mxu0 %v708_v0  ;;  %v593_v13 = vpack.c.bf16 %v270_v12, %v269_v11  ;;  %v596_v16 = vpack.c.bf16 %v272_v15, %v271_v14  ;;  %v368_v17 = vld [vmem:[%s862_s4] ss:$0 sm:$0xff] }
  0x48   :  { %561 = vmatpush3.bf16.msra.mxu1 %v560_v30  ;;  %v369_v22 = vld [vmem:[%s864_s6] ss:$0 sm:$0xff] }
  0x49   :  { %562 = vmatprep.subr.bf16.mxu1 %v708_v0 }
  0x4a   :  { %540 = vmatpush3.bf16.msra.mxu0 %v539_v27 }
  0x4b   :  { %541 = vmatprep.subr.bf16.mxu0 %v708_v0 }
  0x4c   :  { %564 = vmatpush3.bf16.msra.mxu1 %v563_v36 }
  0x4d   :  { %565 = vmatprep.subr.bf16.mxu1 %v708_v0 }
  0x4e   :  { %543 = vmatpush3.bf16.msra.mxu0 %v542_v33 }
  0x4f   :  { %544 = vmatprep.subr.bf16.mxu0 %v708_v0 }
  0x50   :  { %567 = vmatpush3.bf16.msra.mxu1 %v566_v42 }
  0x51   :  { %568 = vmatprep.subr.bf16.mxu1 %v708_v0 }
  0x52   :  { %546 = vmatpush3.bf16.msra.mxu0 %v545_v39 }
  0x53   :  { %547 = vmatprep.subr.bf16.mxu0 %v708_v0 }
  0x54   :  { %570 = vmatpush3.bf16.msra.mxu1 %v569_v46 }
  0x55   :  { %571 = vmatprep.subr.bf16.mxu1 %v708_v0 }
  0x56   :  { %549 = vmatpush3.bf16.msra.mxu0 %v548_v45 }
  0x57   :  { %574 = vmatprep.subr.bf16.mxu0 %v708_v0 }
  0x58   :  { %573 = vmatpush3.bf16.msra.mxu1 %v572_v50 }
  0x59   :  { %454 = vmatmul.mubr.f32.vlgmr.msra.gmra.mrb[0].mxu0 %v68_v47 }
  0x5a   :  { %523 = vmatprep.mubr.msk.f32.mxu0 %vm709_vm0, %v710_v1  ;;  %576 = vmatpush3.bf16.msra.mxu0 %v575_v54  ;;  %v266_v1 = vld [vmem:[#allocation7 + $0x48] sm:$0xff] }
  0x5b   :  { %577 = vmatprep.subr.bf16.mxu0 %v708_v0  ;;  %v587_v2 = vpack.c.bf16 %v266_v1, %v265_v63 }
  0x5e   :  { %579 = vmatpush3.bf16.msra.mxu0 %v578_v56 }
  0x5f   :  { %580 = vmatprep.subr.bf16.mxu0 %v708_v0 }
  0x62   :  { %582 = vmatpush3.bf16.msra.mxu0 %v581_v59 }
  0x63   :  { %583 = vmatprep.subr.bf16.mxu0 %v708_v0 }
  0x66   :  { %585 = vmatpush3.bf16.msra.mxu0 %v584_v62 }
  0x67   :  { %586 = vmatprep.subr.bf16.mxu0 %v708_v0 }
  0x6a   :  { %588 = vmatpush3.bf16.msra.mxu0 %v587_v2 }
  0x6b   :  { %589 = vmatprep.subr.bf16.mxu0 %v708_v0 }
  0x6e   :  { %591 = vmatpush3.bf16.msra.mxu0 %v590_v10 }
  0x6f   :  { %592 = vmatprep.subr.bf16.mxu0 %v708_v0 }
  0x72   :  { %594 = vmatpush3.bf16.msra.mxu0 %v593_v13 }
  0x73   :  { %595 = vmatprep.subr.bf16.mxu0 %v708_v0 }
  0x76   :  { %597 = vmatpush3.bf16.msra.mxu0 %v596_v16 }
 0x12c   :  { %v158_v4 = vpop.f32.mrb[0].mxu0 }
 0x12d   :  { %v159_v5 = vadd.f32 %v367_v3, %v158_v4  ;;  %v455_v6 = vpop.f32.mrb[1].mxu0 }
 0x12f   :  { %v162_v7 = vmax.f32 %v159_v5, 0.0 }
 0x131   :  { %489 = vmatmul.mubr.f32.vlgmr.msra.gmra.mrb[0].mxu1 %v162_v7 }
 0x204   :  { %v252_v18 = vpop.f32.mrb[0].mxu1 }
 0x205   :  { %v253_v19 = vadd.f32 %v368_v17, %v252_v18  ;;  %v490_v20 = vpop.f32.mrb[1].mxu1 }
 0x207   :  { %607 = vtanh.f32 %v253_v19 }
 0x211   :  { %v608_v21 = vpop.eup %607 }
 0x212   :  { %524 = vmatmul.mubr.f32.vlgmr.msra.gmra.mrb[2].mxu0 %v608_v21 }
 0x2e5   :  { %v346_v23 = vpop.f32.mrb[2].mxu0 }
 0x2e6   :  { %v347_v24 = vadd.f32 %v369_v22, %v346_v23  ;;  %v525_v0 = vpop.f32.mrb[3].mxu0 }
 0x2e8   :  { %350 = vst [vmem:[#allocation8] sm:$0xff] %v347_v24 }
 0x2e9   :  { %686 = shalt.err (!%p683_p0)
}
 0x2ea   :  { %s687_s23 = scalar_lea.hbm %s865_s7, 128 }
 0x2eb   :  { %p688_p1 = scmp.ne.s32.totalorder %s865_s7, %s687_s23  ;;  %p691_p2 = scmp.lt.u32.totalorder %s687_s23, %s865_s7 }
 0x2ed   :  { %p693_p3 = pnand %p691_p2, %p688_p1 }
 0x2ef   :  { %696 = shalt.err (!%p693_p3)
}
 0x2f0   :  { %360 = dma.vmem_to_hbm [thread:$0]  %s358_s20, 128, %s865_s7, [#allocation4]  }
 0x2f1   :  { %701 = dma.done.wait [#allocation4], 128  }
 0x2f2   :  { %702 = vsyncadd [#allocation4], 4294967168 }
 0x2f3   :  { %364 = vsyncpa [#allocation3], 1 }
 0x2f4   :  { %365 = vsyncpa [#allocation6], 1 }
 0x2f5   :  { %366 = vsyncpa [#allocation4], 1 }

</bundles_post_ra>
